<compile_context>
chip_gen: v5e
topology: v5e:2x2
jax: 0.10.0
libtpu: 0.0.40
codegen_flags: <defaults>
</compile_context>

<pallas_src>
import functools

import jax
import jax.numpy as jnp
from jax.experimental import pallas as pl
from jax.experimental.pallas import tpu as pltpu


def _sgns_loss_kernel(in_id_ref, ctx_ids_ref, neg_ids_ref, emb_hbm,
                      loss_ref, cvec_ref, rows_ref, sem_ref, *,
                      n_ctx, n_neg):
    """Fused SGNS loss for a single center word.

    in_id_ref   : SMEM (1,)          int32  center-word id
    ctx_ids_ref : SMEM (C,)          int32  context-word ids
    neg_ids_ref : SMEM (C*n_negs,)   int32  negative-sample ids
    emb_hbm     : HBM  (V, D_pad)    f32    embedding table (never enters VMEM whole)
    loss_ref    : VMEM (1, 1)        f32    scalar loss
    cvec_ref    : VMEM (1, D_pad)    f32    gathered center row
    rows_ref    : VMEM (R_pad, D_pad) f32   gathered context + negative rows
    sem_ref     : DMA semaphore shared by all row gathers
    """
    R = n_ctx + n_neg

    def row_copy(src_row, dst_ref, dst_row):
        return pltpu.make_async_copy(
            emb_hbm.at[pl.ds(src_row, 1), :],
            dst_ref.at[pl.ds(dst_row, 1), :],
            sem_ref)

    # Issue every row-gather DMA up front so they all overlap.
    # NOTE: ids must lie in [0, V); an OOB id would be an unchecked OOB DMA
    # (same contract as nn.Embedding).
    row_copy(in_id_ref[0], cvec_ref, 0).start()

    @pl.loop(0, n_ctx)
    def _(i):
        row_copy(ctx_ids_ref[i], rows_ref, i).start()

    @pl.loop(0, n_neg)
    def _(i):
        row_copy(neg_ids_ref[i], rows_ref, n_ctx + i).start()

    # Drain: one wait per issued copy (all copies have the same (1, D_pad) shape).
    @pl.loop(0, 1 + R)
    def _(i):
        row_copy(0, rows_ref, 0).wait()

    invec = cvec_ref[...]                                   # (1, D_pad)
    rows = rows_ref[...]                                    # (R_pad, D_pad)

    # Single lane-dense score row on the MXU: (1, D) . (R_pad, D)^T -> (1, R_pad).
    scores = jax.lax.dot_general(
        invec, rows, (((1,), (1,)), ((), ())),
        preferred_element_type=jnp.float32)

    lane = jax.lax.broadcasted_iota(jnp.int32, scores.shape, 1)
    valid = lane < R
    # Fold nvec.neg() into a per-lane sign (+ for context, - for negatives) and
    # zero pad lanes so uninitialised scratch rows can never produce inf/NaN.
    signed = jnp.where(valid, jnp.where(lane < n_ctx, scores, -scores), 0.0)
    # Stable fused log-sigmoid: log(sigmoid(x)) = min(x, 0) - log1p(exp(-|x|)).
    logsig = jnp.minimum(signed, 0.0) - jnp.log1p(jnp.exp(-jnp.abs(signed)))
    logsig = jnp.where(valid, logsig, 0.0)

    # loss = -(oloss + nloss) = -(sum of all C*(1+n_negs) terms) / C
    loss_ref[...] = -jnp.sum(logsig, axis=1, keepdims=True) * (1.0 / n_ctx)


def negative_sampling_loss(emb, inword, outword, nwords, context_size):
    """Pallas wrapper.

    emb     : (V, D) f32 embedding table (stays in HBM; only used rows are DMA'd)
    inword  : (1,)   int center-word id (bs = 1)
    outword : (C,)   int context-word ids
    nwords  : (C*n_negs,) int negative-sample ids
    """
    V, D = emb.shape
    n_ctx = int(context_size)
    n_neg = int(nwords.shape[0])
    R = n_ctx + n_neg
    R_pad = ((R + 7) // 8) * 8
    D_pad = ((D + 127) // 128) * 128
    if D_pad != D:
        # TODO(synk): store the table pre-padded to a multiple of 128 lanes so
        # this pad is not redone on every training step.
        emb = jnp.pad(emb, ((0, 0), (0, D_pad - D)))

    inword = jnp.asarray(inword, jnp.int32).reshape(-1)
    outword = jnp.asarray(outword, jnp.int32).reshape(-1)
    nwords = jnp.asarray(nwords, jnp.int32).reshape(-1)

    kernel = functools.partial(_sgns_loss_kernel, n_ctx=n_ctx, n_neg=n_neg)
    # TODO(synk): for real batch sizes add a leading "parallel" grid axis over
    # center words (amortizes the ~0.35us per-call overhead and uses both v7x
    # TensorCores); bs = 1 here matches the reference .view(context_size, n_negs).
    return pl.pallas_call(
        kernel,
        out_shape=jax.ShapeDtypeStruct((1, 1), jnp.float32),
        in_specs=[
            pl.BlockSpec(memory_space=pltpu.MemorySpace.SMEM),   # inword id
            pl.BlockSpec(memory_space=pltpu.MemorySpace.SMEM),   # context ids
            pl.BlockSpec(memory_space=pltpu.MemorySpace.SMEM),   # negative ids
            pl.BlockSpec(memory_space=pl.ANY),                   # emb stays in HBM
        ],
        out_specs=pl.BlockSpec(memory_space=pltpu.MemorySpace.VMEM),
        scratch_shapes=[
            pltpu.VMEM((1, D_pad), jnp.float32),       # center row
            pltpu.VMEM((R_pad, D_pad), jnp.float32),   # context + negative rows
            pltpu.SemaphoreType.DMA,
        ],
    )(inword, outword, nwords, emb)


if __name__ == "__main__":
    vocab_size = 64
    embedding_dim = 32
    window_size = 4
    n_negs = 20
    context_size = window_size * 2  # 8

    key = jax.random.PRNGKey(0)
    k_emb, k_wc, k_in, k_out, k_neg = jax.random.split(key, 5)

    # SkipGram.embeddings weight: uniform(-0.5/D, 0.5/D), deterministic init
    emb = jax.random.uniform(
        k_emb, (vocab_size, embedding_dim),
        minval=-0.5 / embedding_dim, maxval=0.5 / embedding_dim,
        dtype=jnp.float32)

    # synthetic wordcount -> unigram^0.75 negative-sampling distribution
    counts = jax.random.randint(k_wc, (vocab_size,), 1, 100).astype(jnp.float32)
    wf = counts / counts.sum()
    wf = wf ** 0.75
    wf = wf / wf.sum()

    bs = 1  # reference's .view(context_size, n_negs) implies batch size 1
    inword = jax.random.randint(k_in, (bs,), 0, vocab_size)
    outword = jax.random.randint(k_out, (context_size,), 0, vocab_size)

    # TODO(synk): torch.multinomial sampling has no Pallas equivalent; negatives
    # are drawn deterministically in plain JAX with the same ^0.75 distribution.
    nwords = jax.random.choice(
        k_neg, vocab_size, (bs * context_size * n_negs,), replace=True, p=wf)

    loss = negative_sampling_loss(emb, inword, outword, nwords, context_size)
    jax.block_until_ready(loss)

    # cross-check against a pure-JAX reference of the PyTorch math
    invec = emb[inword]      # (1, D)
    outvec = emb[outword]    # (C, D)
    nvec = emb[nwords]       # (C*n_negs, D)
    o_ref = jnp.mean(jnp.log(jax.nn.sigmoid(outvec @ invec.T)))
    n_ref = jnp.mean(jnp.sum(
        jnp.log(jax.nn.sigmoid((-nvec) @ invec.T)).reshape(context_size, n_negs),
        axis=1))
    ref = -(o_ref + n_ref)
    assert jnp.allclose(loss[0, 0], ref, atol=1e-5, rtol=1e-5)

    print("KERNEL_OK")
</pallas_src>

<mosaic_0001>
module attributes {stable_mosaic.version = 11 : i64} {
  func.func @_sgns_loss_kernel(%arg0: memref<1xi32, #tpu.memory_space<smem>>, %arg1: memref<8xi32, #tpu.memory_space<smem>>, %arg2: memref<160xi32, #tpu.memory_space<smem>>, %arg3: memref<64x128xf32, #tpu.memory_space<any>>, %arg4: memref<1x1xf32, #tpu.memory_space<vmem>>, %arg5: memref<1x128xf32, #tpu.memory_space<vmem>>, %arg6: memref<168x128xf32, #tpu.memory_space<vmem>>, %arg7: memref<!tpu.dma_semaphore, #tpu.memory_space<semaphore_mem>>) attributes {dimension_semantics = [], scalar_prefetch = 0 : i64, scratch_operands = 3 : i64, tpu.core_type = #tpu.core_type<tc>} {
    %c0 = arith.constant 0 : index
    %0 = memref.load %arg0[%c0] : memref<1xi32, #tpu.memory_space<smem>>
    %c0_i32 = arith.constant 0 : i32
    %1 = tpu.memref_slice %arg3[%0, %c0_i32] : memref<64x128xf32, #tpu.memory_space<any>> -> memref<1x128xf32, #tpu.memory_space<any>>
    %c0_i32_0 = arith.constant 0 : i32
    %c0_i32_1 = arith.constant 0 : i32
    %2 = tpu.memref_slice %arg5[%c0_i32_0, %c0_i32_1] : memref<1x128xf32, #tpu.memory_space<vmem>> -> memref<1x128xf32, #tpu.memory_space<vmem>>
    tpu.enqueue_dma source(%1 : memref<1x128xf32, #tpu.memory_space<any>>) target(%2 : memref<1x128xf32, #tpu.memory_space<vmem>>) target_semaphore(%arg7 : memref<!tpu.dma_semaphore, #tpu.memory_space<semaphore_mem>>)
    %c0_i32_2 = arith.constant 0 : i32
    %c8_i32 = arith.constant 8 : i32
    %3 = arith.addi %c0_i32_2, %c8_i32 : i32
    %c1_i32 = arith.constant 1 : i32
    scf.for %arg8 = %c0_i32_2 to %3 step %c1_i32  : i32 {
      %c1_i32_24 = arith.constant 1 : i32
      %36 = arith.muli %arg8, %c1_i32_24 : i32
      %c0_i32_25 = arith.constant 0 : i32
      %37 = arith.addi %c0_i32_25, %36 : i32
      %38 = arith.index_cast %37 : i32 to index
      %39 = memref.load %arg1[%38] : memref<8xi32, #tpu.memory_space<smem>>
      %c0_i32_26 = arith.constant 0 : i32
      %40 = tpu.memref_slice %arg3[%39, %c0_i32_26] : memref<64x128xf32, #tpu.memory_space<any>> -> memref<1x128xf32, #tpu.memory_space<any>>
      %c0_i32_27 = arith.constant 0 : i32
      %41 = tpu.memref_slice %arg6[%37, %c0_i32_27] : memref<168x128xf32, #tpu.memory_space<vmem>> -> memref<1x128xf32, #tpu.memory_space<vmem>>
      tpu.enqueue_dma source(%40 : memref<1x128xf32, #tpu.memory_space<any>>) target(%41 : memref<1x128xf32, #tpu.memory_space<vmem>>) target_semaphore(%arg7 : memref<!tpu.dma_semaphore, #tpu.memory_space<semaphore_mem>>)
    }
    %c8_i32_3 = arith.constant 8 : i32
    %c0_i32_4 = arith.constant 0 : i32
    %c160_i32 = arith.constant 160 : i32
    %4 = arith.addi %c0_i32_4, %c160_i32 : i32
    %c1_i32_5 = arith.constant 1 : i32
    scf.for %arg8 = %c0_i32_4 to %4 step %c1_i32_5  : i32 {
      %c1_i32_24 = arith.constant 1 : i32
      %36 = arith.muli %arg8, %c1_i32_24 : i32
      %c0_i32_25 = arith.constant 0 : i32
      %37 = arith.addi %c0_i32_25, %36 : i32
      %38 = arith.index_cast %37 : i32 to index
      %39 = memref.load %arg2[%38] : memref<160xi32, #tpu.memory_space<smem>>
      %c8_i32_26 = arith.constant 8 : i32
      %40 = arith.addi %c8_i32_26, %37 : i32
      %c0_i32_27 = arith.constant 0 : i32
      %41 = tpu.memref_slice %arg3[%39, %c0_i32_27] : memref<64x128xf32, #tpu.memory_space<any>> -> memref<1x128xf32, #tpu.memory_space<any>>
      %c0_i32_28 = arith.constant 0 : i32
      %42 = tpu.memref_slice %arg6[%40, %c0_i32_28] : memref<168x128xf32, #tpu.memory_space<vmem>> -> memref<1x128xf32, #tpu.memory_space<vmem>>
      tpu.enqueue_dma source(%41 : memref<1x128xf32, #tpu.memory_space<any>>) target(%42 : memref<1x128xf32, #tpu.memory_space<vmem>>) target_semaphore(%arg7 : memref<!tpu.dma_semaphore, #tpu.memory_space<semaphore_mem>>)
    }
    %c160_i32_6 = arith.constant 160 : i32
    %c0_i32_7 = arith.constant 0 : i32
    %c169_i32 = arith.constant 169 : i32
    %5 = arith.addi %c0_i32_7, %c169_i32 : i32
    %c1_i32_8 = arith.constant 1 : i32
    scf.for %arg8 = %c0_i32_7 to %5 step %c1_i32_8  : i32 {
      %c0_i32_24 = arith.constant 0 : i32
      %c0_i32_25 = arith.constant 0 : i32
      %36 = tpu.memref_slice %arg3[%c0_i32_24, %c0_i32_25] : memref<64x128xf32, #tpu.memory_space<any>> -> memref<1x128xf32, #tpu.memory_space<any>>
      %c0_i32_26 = arith.constant 0 : i32
      %c0_i32_27 = arith.constant 0 : i32
      %37 = tpu.memref_slice %arg6[%c0_i32_26, %c0_i32_27] : memref<168x128xf32, #tpu.memory_space<vmem>> -> memref<1x128xf32, #tpu.memory_space<vmem>>
      tpu.wait_dma2 semaphore(%arg7 : memref<!tpu.dma_semaphore, #tpu.memory_space<semaphore_mem>>) src(%36 : memref<1x128xf32, #tpu.memory_space<any>>) dst(%37 : memref<1x128xf32, #tpu.memory_space<vmem>>)
    }
    %c0_9 = arith.constant 0 : index
    %c0_10 = arith.constant 0 : index
    %6 = vector.load %arg5[%c0_9, %c0_10] : memref<1x128xf32, #tpu.memory_space<vmem>>, vector<1x128xf32>
    %c0_11 = arith.constant 0 : index
    %c0_12 = arith.constant 0 : index
    %7 = vector.load %arg6[%c0_11, %c0_12] : memref<168x128xf32, #tpu.memory_space<vmem>>, vector<168x128xf32>
    %cst = arith.constant dense<0.000000e+00> : vector<1x168xf32>
    %8 = tpu.matmul %6, %7, %cst {dimension_numbers = #tpu.dot_dimension_numbers<[1], [1], [0], [0], [0, 0, 1, 0], [], []>} : vector<1x128xf32>, vector<168x128xf32>, vector<1x168xf32> -> vector<1x168xf32>
    %9 = tpu.iota {dimensions = array<i32: 1>} : vector<1x168xi32>
    %c168_i32 = arith.constant 168 : i32
    %10 = vector.broadcast %c168_i32 : i32 to vector<1x168xi32>
    %11 = arith.cmpi slt, %9, %10 : vector<1x168xi32>
    %c8_i32_13 = arith.constant 8 : i32
    %12 = vector.broadcast %c8_i32_13 : i32 to vector<1x168xi32>
    %13 = arith.cmpi slt, %9, %12 : vector<1x168xi32>
    %cst_14 = arith.constant 0.000000e+00 : f32
    %14 = vector.broadcast %cst_14 : f32 to vector<1x168xf32>
    %15 = arith.subf %14, %8 : vector<1x168xf32>
    %16 = arith.select %13, %8, %15 : vector<1x168xi1>, vector<1x168xf32>
    %cst_15 = arith.constant 0.000000e+00 : f32
    %17 = vector.broadcast %cst_15 : f32 to vector<1x168xf32>
    %18 = arith.select %11, %16, %17 : vector<1x168xi1>, vector<1x168xf32>
    %cst_16 = arith.constant 0.000000e+00 : f32
    %19 = vector.broadcast %cst_16 : f32 to vector<1x168xf32>
    %20 = arith.minimumf %18, %19 : vector<1x168xf32>
    %21 = math.absf %18 : vector<1x168xf32>
    %cst_17 = arith.constant 0.000000e+00 : f32
    %22 = vector.broadcast %cst_17 : f32 to vector<1x168xf32>
    %23 = arith.subf %22, %21 : vector<1x168xf32>
    %24 = math.exp %23 : vector<1x168xf32>
    %25 = math.log1p %24 : vector<1x168xf32>
    %26 = arith.subf %20, %25 : vector<1x168xf32>
    %cst_18 = arith.constant 0.000000e+00 : f32
    %27 = vector.broadcast %cst_18 : f32 to vector<1x168xf32>
    %28 = arith.select %11, %26, %27 : vector<1x168xi1>, vector<1x168xf32>
    %cst_19 = arith.constant dense<0.000000e+00> : vector<1xf32>
    %29 = vector.multi_reduction <add>, %28, %cst_19 [1] : vector<1x168xf32> to vector<1xf32>
    %30 = vector.shape_cast %29 : vector<1xf32> to vector<1x1xf32>
    %cst_20 = arith.constant 0.000000e+00 : f32
    %31 = vector.broadcast %cst_20 : f32 to vector<1x1xf32>
    %32 = arith.subf %31, %30 : vector<1x1xf32>
    %cst_21 = arith.constant 1.250000e-01 : f32
    %33 = vector.broadcast %cst_21 : f32 to vector<1x1xf32>
    %34 = arith.mulf %32, %33 : vector<1x1xf32>
    %c0_22 = arith.constant 0 : index
    %c0_23 = arith.constant 0 : index
    %35 = vector.load %arg4[%c0_22, %c0_23] : memref<1x1xf32, #tpu.memory_space<vmem>>, vector<1x1xf32>
    tpu.vector_store %arg4[%c0_22, %c0_23], %34 {strides = array<i32>} : memref<1x1xf32, #tpu.memory_space<vmem>>, vector<1x1xf32>,
    return
  }
}

</mosaic_0001>

<bundles_post_ra>
// kernel: tpu_custom_call.1
= control target key start
LH: loop header
LB: loop body
LE: loop exit
PB: predicated region body
PF: predicated region fallthrough
CT: control target
= control target key end

     0   :  { %10 = vsyncpa [#allocation8], 0  ;;  %s557_s0 = inlined_call_operand.<no memory space> [shape: s32[1], index: 0, kind: input, shape index: {}]   ;;  %s558_s1 = inlined_call_operand.hbm [shape: s32[8], index: 1, kind: input, shape index: {}]   ;;  %s559_s2 = inlined_call_operand.vmem [shape: s32[160], index: 2, kind: input, shape index: {}]   ;;  %s560_s3 = inlined_call_operand.hbm [shape: f32[64,128], index: 3, kind: input, shape index: {}]   ;;  %s561_s4 = inlined_call_operand.hbm [shape: f32[1,1], index: 4, kind: output, shape index: {}]  }
   0x1   :  { %11 = vsyncpa [#allocation9], 0 }
   0x2   :  { %12 = vsyncpa [#allocation7], 0  ;;  %s20_s17 = sshll.u32 %s558_s1, 4  ;;  %s29_s20 = sshll.u32 %s559_s2, 4  ;;  %s21_s17 = int_to_ptr.hbm [resolvable:$true] %s20_s17  ;;  %s30_s20 = int_to_ptr.vmem [resolvable:$true] %s29_s20 }
   0x3   :  { %s463_s21 = smov [#allocation6]   ;;  %s464_s22 = smov [#allocation10]  }
   0x4   :  { %23 = dma.hbm_to_smem %s21_s17, 16, %s463_s21, [#allocation8]  }
   0x5   :  { %32 = dma.vmem_to_smem %s30_s20, 32, %s464_s22, [#allocation9]  }
   0x6   :  { %443 = dma.done.wait [#allocation8], 16  }
   0x7   :  { %444 = vsyncadd [#allocation8], 4294967280 }
   0x8   :  { %445 = dma.done.wait [#allocation9], 32  }
   0x9   :  { %446 = vsyncadd [#allocation9], 4294967264 }
   0xa   :  { %41 = sfence }
   0xb   :  { %s43_s26 = scalar_lea.hbm %s560_s3, %s557_s0  ;;  %s465_s28 = smov [#allocation2]  }
   0xc   :  { %s51_s27 = sshll.u32 %s43_s26, 4  ;;  %s53_s2 = sshll.u32 %s465_s28, 4  ;;  %s52_s27 = int_to_ptr.hbm [resolvable:$true] %s51_s27  ;;  %s54_s2 = int_to_ptr.vmem [resolvable:$true] %s53_s2 }
   0xd   :  { %s335_s29 = sshra.s32 %s52_s27, 4  ;;  %s508_s7 = scalar_lea.hbm %s560_s3, 64  ;;  %s336_s29 = int_to_ptr.hbm [resolvable:$true] %s335_s29 }
   0xe   :  { %s337_s30 = scalar_lea.hbm %s336_s29, 1  ;;  %p340_p1 = scmp.lt.s32.totalorder %s336_s29, %s560_s3 }
   0xf   :  { %p338_p0 = scmp.ne.s32.totalorder %s336_s29, %s337_s30  ;;  %p341_p2 = scmp.lt.s32.totalorder %s508_s7, %s337_s30 }
  0x11   :  { %p342_p3 = por %p341_p2, %p340_p1 }
  0x13   :  { %p343_p4 = pnand %p342_p3, %p338_p0 }
  0x15   :  { %346 = shalt.err (!%p343_p4)  }
  0x16   :  { %56 = dma.hbm_to_vmem [thread:$0]  %s52_s27, 16, %s54_s2, [#allocation4] }
  0x17   :  { %s514_s0 = smov 0  }
  0x18 LB: > { %s63_s10 = sld [smem:[#allocation6 + %s453_s0]]  ;;  %s65_s11 = scalar_lea.vmem [#allocation3], %s453_s0  ;;  %s453_s0 = sphi %s514_s0, %s62_s0  }
  0x19   : > { %s75_s12 = sshll.u32 %s65_s11, 4  ;;  %s76_s12 = int_to_ptr.vmem [resolvable:$true] %s75_s12 }
  0x1e   : > { %s64_s15 = scalar_lea.hbm %s560_s3, %s63_s10 }
  0x1f   : > { %s73_s16 = sshll.u32 %s64_s15, 4  ;;  %s74_s16 = int_to_ptr.hbm [resolvable:$true] %s73_s16 }
  0x20   : > { %s359_s17 = sshra.s32 %s74_s16, 4  ;;  %s360_s17 = int_to_ptr.hbm [resolvable:$true] %s359_s17 }
  0x21   : > { %s361_s18 = scalar_lea.hbm %s360_s17, 1  ;;  %p364_p6 = scmp.lt.s32.totalorder %s360_s17, %s560_s3 }
  0x22   : > { %p362_p5 = scmp.ne.s32.totalorder %s360_s17, %s361_s18  ;;  %p365_p7 = scmp.lt.s32.totalorder %s508_s7, %s361_s18 }
  0x24   : > { %p366_p8 = por %p365_p7, %p364_p6 }
  0x26   : > { %p367_p9 = pnand %p366_p8, %p362_p5 }
  0x28   : > { %370 = shalt.err (!%p367_p9)  }
  0x29   : > { %s371_s21 = sshra.s32 %s76_s12, 4  ;;  %s466_s23 = smov [#allocation3]   ;;  %s372_s21 = int_to_ptr.vmem [resolvable:$true] %s371_s21 }
  0x2a   : > { %s373_s22 = scalar_lea.vmem %s372_s21, 1  ;;  %s528_s24 = scalar_lea.vmem %s466_s23, 168 }
  0x2b   : > { %p374_p10 = scmp.ne.s32.totalorder %s372_s21, %s373_s22  ;;  %p376_p11 = scmp.lt.s32.totalorder %s372_s21, [#allocation3] }
  0x2c   : > { %p377_p12 = scmp.lt.s32.totalorder %s528_s24, %s373_s22 }
  0x2e   : > { %p378_p13 = por %p377_p12, %p376_p11 }
  0x30   : > { %p379_p0 = pnand %p378_p13, %p374_p10 }
  0x32   : > { %382 = shalt.err (!%p379_p0)  }
  0x33   : > { %78 = dma.hbm_to_vmem [thread:$0]  %s74_s16, 16, %s76_s12, [#allocation4] }
  0x34   : > { %s62_s0 = sadd.s32 1, %s453_s0  }
  0x35   : > { %p59_p1 = scmp.ge.s32.totalorder %s62_s0, 8  }
  0x36   :  { %s534_s25 = smov (%p59_p1), 0  }
  0x37   :  { %61 = sbr.rel (!%p59_p1) target bundleno = 24 (0x18), region = 78 }
  0x3c LB: > { %s85_s1 = sld [smem:[#allocation10 + %s457_s25]]  ;;  %s257_s26 = scalar_lea.vmem [#allocation3], %s457_s25  ;;  %s457_s25 = sphi %s534_s25, %s84_s25  }
  0x3d   : > { %s258_s27 = scalar_lea.vmem %s257_s26, 8 [#allocation3] }
  0x3e   : > { %s98_s28 = sshll.u32 %s258_s27, 4  ;;  %s99_s28 = int_to_ptr.vmem [resolvable:$true] %s98_s28 }
  0x42   : > { %s87_s30 = scalar_lea.hbm %s560_s3, %s85_s1 }
  0x43   : > { %s96_s5 = sshll.u32 %s87_s30, 4  ;;  %s97_s5 = int_to_ptr.hbm [resolvable:$true] %s96_s5 }
  0x44   : > { %s383_s6 = sshra.s32 %s97_s5, 4  ;;  %s384_s6 = int_to_ptr.hbm [resolvable:$true] %s383_s6 }
  0x45   : > { %s385_s8 = scalar_lea.hbm %s384_s6, 1  ;;  %p388_p3 = scmp.lt.s32.totalorder %s384_s6, %s560_s3 }
  0x46   : > { %p386_p2 = scmp.ne.s32.totalorder %s384_s6, %s385_s8  ;;  %p389_p4 = scmp.lt.s32.totalorder %s508_s7, %s385_s8 }
  0x48   : > { %p390_p5 = por %p389_p4, %p388_p3 }
  0x4a   : > { %p391_p6 = pnand %p390_p5, %p386_p2 }
  0x4c   : > { %394 = shalt.err (!%p391_p6)  }
  0x4d   : > { %s395_s10 = sshra.s32 %s99_s28, 4  ;;  %s396_s10 = int_to_ptr.vmem [resolvable:$true] %s395_s10 }
  0x4e   : > { %s397_s11 = scalar_lea.vmem %s396_s10, 1  ;;  %p400_p8 = scmp.lt.s32.totalorder %s396_s10, [#allocation3] }
  0x4f   : > { %p398_p7 = scmp.ne.s32.totalorder %s396_s10, %s397_s11  ;;  %p401_p9 = scmp.lt.s32.totalorder %s528_s24, %s397_s11 }
  0x51   : > { %p402_p10 = por %p401_p9, %p400_p8 }
  0x53   : > { %p403_p11 = pnand %p402_p10, %p398_p7 }
  0x55   : > { %406 = shalt.err (!%p403_p11)  }
  0x56   : > { %101 = dma.hbm_to_vmem [thread:$0]  %s97_s5, 16, %s99_s28, [#allocation4] }
  0x57   : > { %s84_s25 = sadd.s32 1, %s457_s25  }
  0x58   : > { %p81_p12 = scmp.ge.s32.totalorder %s84_s25, 160  }
  0x59   :  { %s459_s12 = smov (%p81_p12), 0  }
  0x5a   :  { %83 = sbr.rel (!%p81_p12) target bundleno = 60 (0x3c), region = 89 }
  0x5f LB: > { %447 = dma.done.wait [#allocation4], 16  ;;  %s461_s12 = sphi %s459_s12, %s107_s12  }
  0x60   : > { %448 = vsyncadd [#allocation4], 4294967280  ;;  %s107_s12 = sadd.s32 1, %s461_s12  }
  0x61   : > { %p104_p13 = scmp.ge.s32.totalorder %s107_s12, 169  }
  0x62   :  { %v127_v0 = vld [vmem:[#allocation3 + $0x78] sm:$0xff] (%p104_p13)  ;;  %v126_v1 = vld [vmem:[#allocation3 + $0x70] sm:$0xff] (%p104_p13)  ;;  %v132_v2 = vld [vmem:[#allocation3 + $0xa0] sm:$0xff] (%p104_p13)  ;;  %v173_v22 = vlaneseq (%p104_p13)  ;;  %vm218_vm4 = vcmask (%p104_p13), 1040384   ;;  %vm220_vm5 = vcmask (%p104_p13), 319488   ;;  %s467_s3 = smov (%p104_p13), [#allocation11]  }
  0x63   :  { %106 = sbr.rel (!%p104_p13) target bundleno = 95 (0x5f), region = 100  ;;  %133 = vmatpush.xpose.msra.mxu0 (%p104_p13), %v127_v0  ;;  %164 = vmatpush.xpose.msra.mxu1 (%p104_p13), %v132_v2  ;;  %v131_v3 = vld [vmem:[#allocation3 + $0x98] sm:$0xff] (%p104_p13)  ;;  %v125_v4 = vld [vmem:[#allocation3 + $0x68] sm:$0xff] (%p104_p13)  ;;  %v130_v5 = vld [vmem:[#allocation3 + $0x90] sm:$0xff] (%p104_p13)  ;;  %s234_s7 = sshll.u32 (%p104_p13), %s467_s3, 4  ;;  %vm227_vm6 = vcmask (%p104_p13), 0   ;;  %s235_s7 = int_to_ptr.vmem [resolvable:$true] %s234_s7 }
  0x64   :  { %v124_v6 = vld [vmem:[#allocation3 + $0x60] sm:$0xff] (%p104_p13)  ;;  %v129_v7 = vld [vmem:[#allocation3 + $0x88] sm:$0xff] (%p104_p13)  ;;  %v123_v8 = vld [vmem:[#allocation3 + $0x58] sm:$0xff] (%p104_p13)  ;;  %v174_v23 = vand.u32 (%p104_p13), 127, %v173_v22  ;;  %s236_s15 = sshll.u32 (%p104_p13), %s561_s4, 4  ;;  %s237_s15 = int_to_ptr.hbm [resolvable:$true] %s236_s15 }
  0x65   :  { %v128_v9 = vld [vmem:[#allocation3 + $0x80] sm:$0xff] (%p104_p13)  ;;  %v122_v10 = vld [vmem:[#allocation3 + $0x50] sm:$0xff] (%p104_p13)  ;;  %v111_v11 = vld [vmem:[#allocation2] sm:$0x1] (%p104_p13) }
  0x66   :  { %v121_v12 = vld [vmem:[#allocation3 + $0x48] sm:$0xff] (%p104_p13)  ;;  %v120_v13 = vld [vmem:[#allocation3 + $0x40] sm:$0xff] (%p104_p13)  ;;  %v119_v14 = vld [vmem:[#allocation3 + $0x38] sm:$0xff] (%p104_p13)  ;;  %v175_v25 = vadd.s32 (%p104_p13), 128, %v174_v23  ;;  %vm178_vm1 = vcmp.lt.s32.totalorder (%p104_p13), %v174_v23, 8 }
  0x67   :  { %134 = vmatpush.xpose.msra.mxu0 (%p104_p13), %v126_v1  ;;  %165 = vmatpush.xpose.msra.mxu1 (%p104_p13), %v131_v3  ;;  %v118_v15 = vld [vmem:[#allocation3 + $0x30] sm:$0xff] (%p104_p13)  ;;  %v117_v16 = vld [vmem:[#allocation3 + $0x28] sm:$0xff] (%p104_p13)  ;;  %v116_v17 = vld [vmem:[#allocation3 + $0x20] sm:$0xff] (%p104_p13) }
  0x68   :  { %v115_v18 = vld [vmem:[#allocation3 + $0x18] sm:$0xff]  ;;  %v114_v19 = vld [vmem:[#allocation3 + $0x10] sm:$0xff]  ;;  %v113_v20 = vld [vmem:[#allocation3 + $0x8] sm:$0xff]  ;;  %vm177_vm0 = vcmp.lt.s32.totalorder %v175_v25, 168 }
  0x69   :  { %v112_v21 = vld [vmem:[#allocation3] sm:$0xff] }
  0x6b   :  { %135 = vmatpush.xpose.msra.mxu0 %v125_v4  ;;  %166 = vmatpush.xpose.msra.mxu1 %v130_v5 }
  0x6f   :  { %136 = vmatpush.xpose.msra.mxu0 %v124_v6  ;;  %167 = vmatpush.xpose.msra.mxu1 %v129_v7 }
  0x73   :  { %137 = vmatpush.xpose.msra.mxu0 %v123_v8  ;;  %168 = vmatpush.xpose.msra.mxu1 %v128_v9 }
  0x76   :  { %169 = vmatmul.f32.vlgmr.msra.gmra.mxu1 %v111_v11 }
  0x77   :  { %138 = vmatpush.xpose.msra.mxu0 %v122_v10 }
  0x7b   :  { %139 = vmatpush.xpose.msra.mxu0 %v121_v12 }
  0x7f   :  { %140 = vmatpush.xpose.msra.mxu0 %v120_v13 }
  0x83   :  { %141 = vmatpush.xpose.msra.mxu0 %v119_v14 }
  0x87   :  { %142 = vmatpush.xpose.msra.mxu0 %v118_v15 }
  0x8b   :  { %143 = vmatpush.xpose.msra.mxu0 %v117_v16 }
  0x8f   :  { %144 = vmatpush.xpose.msra.mxu0 %v116_v17 }
  0x93   :  { %145 = vmatpush.xpose.msra.mxu0 %v115_v18 }
  0x97   :  { %146 = vmatpush.xpose.msra.mxu0 %v114_v19 }
  0x9b   :  { %147 = vmatpush.xpose.msra.mxu0 %v113_v20 }
  0x9f   :  { %148 = vmatpush.xpose.msra.mxu0 %v112_v21 }
  0xa2   :  { %149 = vmatmul.f32.vlgmr.msra.gmra.mxu0 %v111_v11 }
  0xf3   :  { %v170_v24 = vpop.f32.mrf.mxu1 }
  0xf4   :  { %v181_v26 = vsub.f32 0.0, %v170_v24 }
  0xf6   :  { %v185_v27 = vsel %vm177_vm0, %v181_v26, 0.0 }
  0xf7   :  { %v189_v28 = vand.u32 2147483647, %v185_v27  ;;  %v187_v48 = vmin.f32 %v185_v27, 0.0 }
  0xf9   :  { %v191_v29 = vsub.f32 0.0, %v189_v28 }
  0xfb   :  { %v194_v30 = vmul.f32 1.442695, %v191_v29 }
  0xfd   :  { %303 = vpow2.f32 %v194_v30 }
 0x103   :  { %v304_v32 = vpop.eup %303 }
 0x104   :  { %v205_v36 = vadd.f32 1.0, %v304_v32  ;;  %v208_v39 = vmul.f32 -0.5, %v304_v32  ;;  %v211_v42 = vand.u32 2147483647, %v304_v32 }
 0x106   :  { %305 = vlog2.f32 %v205_v36  ;;  %v209_v40 = vadd.f32 1.0, %v208_v39  ;;  %vm212_vm2 = vcmp.lt.f32.partialorder %v211_v42, 0.0004427343 }
 0x108   :  { %v210_v46 = vmul.f32 %v304_v32, %v209_v40 }
 0x10c   :  { %v306_v41 = vpop.eup %305 }
 0x10d   :  { %v207_v45 = vmul.f32 0.6931472, %v306_v41 }
 0x10f   :  { %v213_v49 = vsel %vm212_vm2, %v210_v46, %v207_v45 }
 0x110   :  { %v215_v52 = vsub.f32 %v187_v48, %v213_v49 }
 0x112   :  { %v217_v58 = vsel %vm177_vm0, %v215_v52, 0.0 }
 0x113   :  { %v221_v61 = vsel %vm220_vm5, %v217_v58, 0.0 }
 0x11f   :  { %v150_v31 = vpop.f32.mrf.mxu0 }
 0x120   :  { %v180_v33 = vsub.f32 0.0, %v150_v31 }
 0x122   :  { %v182_v34 = vsel %vm178_vm1, %v150_v31, %v180_v33 }
 0x123   :  { %v188_v35 = vand.u32 2147483647, %v182_v34  ;;  %v186_v56 = vmin.f32 %v182_v34, 0.0 }
 0x125   :  { %v190_v37 = vsub.f32 0.0, %v188_v35 }
 0x127   :  { %v192_v38 = vmul.f32 1.442695, %v190_v37 }
 0x129   :  { %307 = vpow2.f32 %v192_v38 }
 0x12f   :  { %v308_v43 = vpop.eup %307 }
 0x130   :  { %v196_v44 = vadd.f32 1.0, %v308_v43  ;;  %v199_v47 = vmul.f32 -0.5, %v308_v43  ;;  %v202_v51 = vand.u32 2147483647, %v308_v43 }
 0x132   :  { %309 = vlog2.f32 %v196_v44  ;;  %v200_v50 = vadd.f32 1.0, %v199_v47  ;;  %vm203_vm3 = vcmp.lt.f32.partialorder %v202_v51, 0.0004427343 }
 0x134   :  { %v201_v55 = vmul.f32 %v308_v43, %v200_v50 }
 0x138   :  { %v310_v53 = vpop.eup %309 }
 0x139   :  { %v198_v54 = vmul.f32 0.6931472, %v310_v53 }
 0x13b   :  { %v204_v57 = vsel %vm203_vm3, %v201_v55, %v198_v54 }
 0x13c   :  { %v214_v59 = vsub.f32 %v186_v56, %v204_v57 }
 0x13e   :  { %v219_v60 = vsel %vm218_vm4, %v214_v59, 0.0 }
 0x13f   :  { %v222_v62 = vadd.f32 %v221_v61, %v219_v60 }
 0x141   :  { %223 = vadd.xlane.f32.xlu0 %v222_v62 }
 0x1b4   :  { %v224_v63 = vpop.xlane.xlu0 %223 }
 0x1b5   :  { %v225_v0 = vsub.f32 0.0, %v224_v63 }
 0x1b7   :  { %v226_v1 = vmul.f32 0.125, %v225_v0 }
 0x1b9   :  { %228 = vst.msk [vmem:[#allocation11] sm:$0x1] %vm227_vm6, %v226_v1 }
 0x1ba   :  { %239 = dma.vmem_to_hbm [thread:$0]  %s235_s7, 16, %s237_s15, [#allocation7]  }
 0x1bb   :  { %449 = dma.done.wait [#allocation7], 16  }
 0x1bc   :  { %450 = vsyncadd [#allocation7], 4294967280 }
 0x1bd   :  { %244 = vsyncpa [#allocation7], 1 }
 0x1be   :  { %245 = vsyncpa [#allocation8], 1 }
 0x1bf   :  { %246 = vsyncpa [#allocation9], 1 }
 0x1c0   :  { %247 = vsyncmov [#allocation4] }
 0x1c3   :  { %s248_s16 = vpop.sfrf %247 }
 0x1c4   :  { %p274_p0 = scmp.ne.s32.totalorder %s248_s16, 0 }
 0x1c6   :  { %252 = shalt.err (%p274_p0)  }

</bundles_post_ra>
